<compile_context>
chip_gen: v6e
topology: v6e:2x2x1
jax: 0.10.0
libtpu: 0.0.40
codegen_flags: <defaults>
</compile_context>

<pallas_src>
import math

import jax
import jax.numpy as jnp
from jax.experimental import pallas as pl
from jax.experimental.pallas import tpu as pltpu

LANE = 128
NEG_BIG = -1e30   # padded-action bias -> exp(logit - max) == 0 under softmax


def _round_up(x, m):
    return ((x + m - 1) // m) * m


def _device_kind():
    try:
        return jax.devices()[0].device_kind.lower()
    except Exception:
        return ""


def _default_mm_dtype():
    # v6e/v7x: bf16-native MXU (f32 matmuls are multi-pass); v5e: keep f32.
    return jnp.float32 if "v5" in _device_kind() else jnp.bfloat16


def _default_batch_tile():
    # Per-step overhead (~0.35 us) amortization; weights are VMEM-resident so
    # per-step HBM traffic is only the x/out tile.
    return 512 if "v5" in _device_kind() else 1024


def policy_kernel(x_ref, bt_ref, w1a_ref, w1b_ref, b1_ref, w2_ref, b2_ref,
                  w3_ref, b3_ref, out_ref):
    x = x_ref[...].astype(jnp.float32)     # [TB, input_dim]
    bt = bt_ref[...]                       # [input_dim, F]; 2*pi already folded in

    # Fourier projection: contraction depth == input_dim (2) is far too
    # shallow for the MXU -> broadcast FMAs on the VPU.
    input_dim = x_ref.shape[1]
    proj = x[:, 0:1] * bt[0:1, :]
    for k in range(1, input_dim):
        proj = proj + x[:, k:k + 1] * bt[k:k + 1, :]

    s = jnp.sin(proj)
    c = jnp.cos(proj)

    def mm(a, w_ref):
        # Weights are pre-cast to the matmul dtype in prepare_params; only the
        # activation operand is cast here.  Always accumulate in f32.
        w = w_ref[...]
        return jnp.dot(a.astype(w.dtype), w, preferred_element_type=jnp.float32)

    # Layer 1: W1 pre-split (sin half / cos half) -> no lane-axis concat.
    h1 = jnp.maximum(mm(s, w1a_ref) + mm(c, w1b_ref) + b1_ref[...], 0.0)
    h2 = jnp.maximum(mm(h1, w2_ref) + b2_ref[...], 0.0)

    # Layer 3 over the lane-dense (padded-to-128) action axis; padded bias
    # columns are -1e30 so they contribute 0 to the softmax.
    logits = mm(h2, w3_ref) + b3_ref[...]

    m = jnp.max(logits, axis=-1, keepdims=True)
    e = jnp.exp(logits - m)
    denom = jnp.sum(e, axis=-1, keepdims=True)
    out_ref[...] = (e * pl.reciprocal(denom, approx=False)).astype(out_ref.dtype)


def prepare_params(B, w1, b1, w2, b2, w3, b3, mm_dtype=None):
    """One-time weight prep: transposes, W1 split, 2*pi fold, action-axis pad
    to 128 lanes, and weight pre-cast to the matmul dtype."""
    if mm_dtype is None:
        mm_dtype = _default_mm_dtype()
    fourier_dim = B.shape[0]
    n_actions = w3.shape[0]
    n_pad = _round_up(max(n_actions, LANE), LANE)

    bt = ((2.0 * math.pi) * B.T).astype(jnp.float32)        # [input_dim, F]
    w1t = w1.T
    w1a = w1t[:fourier_dim].astype(mm_dtype)                 # multiplies sin
    w1b = w1t[fourier_dim:].astype(mm_dtype)                 # multiplies cos
    w2t = w2.T.astype(mm_dtype)

    w3t = jnp.pad(w3.T.astype(mm_dtype), ((0, 0), (0, n_pad - n_actions)))
    b3p = jnp.pad(b3.reshape(1, -1).astype(jnp.float32),
                  ((0, 0), (0, n_pad - n_actions)), constant_values=NEG_BIG)

    return (bt, w1a, w1b, b1.reshape(1, -1).astype(jnp.float32),
            w2t, b2.reshape(1, -1).astype(jnp.float32), w3t, b3p, n_actions)


def policy_forward(x, prepared, *, batch_tile=None):
    """x: [batch, input_dim] float32; `prepared` comes from prepare_params()."""
    batch, input_dim = x.shape
    bt, w1a, w1b, b1r, w2t, b2r, w3t, b3p, n_actions = prepared
    fourier_dim = bt.shape[1]
    hidden = w1a.shape[1]
    n_pad = w3t.shape[1]

    if batch_tile is None:
        batch_tile = _default_batch_tile()
    tb = min(batch_tile, _round_up(batch, 8))
    padded = _round_up(batch, tb)
    if padded != batch:
        x = jnp.pad(x, ((0, padded - batch), (0, 0)))
    grid = (padded // tb,)

    # v7x has 2 TensorCores/chip; CORE_PARALLEL actually shards the batch axis
    # across them.  Plain "parallel" elsewhere (1 TC on v5e/v6e).
    kind = _device_kind()
    batch_sem = (pltpu.CORE_PARALLEL if ("v7" in kind and grid[0] > 1)
                 else "parallel")

    const = lambda i: (0, 0)   # weights/biases: DMA'd once, VMEM-resident
    grid_spec = pltpu.PrefetchScalarGridSpec(
        num_scalar_prefetch=0,
        grid=grid,
        in_specs=[
            pl.BlockSpec((tb, input_dim), lambda i: (i, 0)),    # x tile
            pl.BlockSpec((input_dim, fourier_dim), const),      # 2*pi * B.T
            pl.BlockSpec((fourier_dim, hidden), const),         # W1 (sin half)
            pl.BlockSpec((fourier_dim, hidden), const),         # W1 (cos half)
            pl.BlockSpec((1, hidden), const),                   # b1
            pl.BlockSpec((hidden, hidden), const),              # W2
            pl.BlockSpec((1, hidden), const),                   # b2
            pl.BlockSpec((hidden, n_pad), const),               # W3 (padded)
            pl.BlockSpec((1, n_pad), const),                    # b3 (padded)
        ],
        # Lane-dense output slab (TB, 128): unmasked stores.
        out_specs=pl.BlockSpec((tb, n_pad), lambda i: (i, 0)),
    )

    out = pl.pallas_call(
        policy_kernel,
        out_shape=jax.ShapeDtypeStruct((padded, n_pad), jnp.float32),
        grid_spec=grid_spec,
        compiler_params=pltpu.CompilerParams(
            dimension_semantics=(batch_sem,)),
    )(x, bt, w1a, w1b, b1r, w2t, b2r, w3t, b3p)

    return out[:batch, :n_actions]


def init_params(key, input_dim=2, fourier_dim=32, hidden_dim=128, n_actions=4):
    ks = jax.random.split(key, 7)
    # buffer B = randn(fourier_dim, input_dim) * 10
    B = jax.random.normal(ks[0], (fourier_dim, input_dim), jnp.float32) * 10.0

    def linear(kw, kb, out_f, in_f):
        bound = 1.0 / math.sqrt(in_f)
        w = jax.random.uniform(kw, (out_f, in_f), jnp.float32, -bound, bound)
        b = jax.random.uniform(kb, (out_f,), jnp.float32, -bound, bound)
        return w, b

    w1, b1 = linear(ks[1], ks[2], hidden_dim, 2 * fourier_dim)
    w2, b2 = linear(ks[3], ks[4], hidden_dim, hidden_dim)
    w3, b3 = linear(ks[5], ks[6], n_actions, hidden_dim)
    return B, w1, b1, w2, b2, w3, b3


def reference_forward(x, B, w1, b1, w2, b2, w3, b3):
    proj = 2.0 * math.pi * x @ B.T
    phi = jnp.concatenate([jnp.sin(proj), jnp.cos(proj)], axis=-1)
    h1 = jax.nn.relu(phi @ w1.T + b1)
    h2 = jax.nn.relu(h1 @ w2.T + b2)
    logits = h2 @ w3.T + b3
    return jax.nn.softmax(logits, axis=-1)


if __name__ == "__main__":
    key = jax.random.PRNGKey(0)
    kp, kx = jax.random.split(key)
    raw_params = init_params(kp)

    batch, input_dim = 8, 2
    x = jax.random.uniform(kx, (batch, input_dim), jnp.float32)
    ref = reference_forward(x, *raw_params)

    # Strict correctness check: f32 matmul path against the f32 reference.
    prepared_f32 = prepare_params(*raw_params, mm_dtype=jnp.float32)
    out = jax.block_until_ready(policy_forward(x, prepared_f32))
    assert out.shape == (batch, 4)
    assert jnp.allclose(out, ref, atol=1e-4, rtol=1e-4), "mismatch vs reference (f32)"
    assert jnp.allclose(jnp.sum(out, axis=-1), 1.0, atol=1e-5), "softmax rows must sum to 1"

    # Device-default matmul dtype (bf16 operands / f32 accumulate on v6e/v7x):
    # looser tolerance against the f32 reference.
    prepared = prepare_params(*raw_params)
    out2 = jax.block_until_ready(policy_forward(x, prepared))
    assert out2.shape == (batch, 4)
    assert jnp.allclose(jnp.sum(out2, axis=-1), 1.0, atol=1e-5), "softmax rows must sum to 1"
    assert jnp.allclose(out2, ref, atol=5e-2, rtol=5e-2), "mismatch vs reference (device dtype)"

    print("KERNEL_OK")
</pallas_src>

<mosaic_0001>
module attributes {stable_mosaic.version = 11 : i64} {
  func.func @policy_kernel(%arg0: i32, %arg1: memref<8x2xf32, #tpu.memory_space<vmem>>, %arg2: memref<2x32xf32, #tpu.memory_space<vmem>>, %arg3: memref<32x128xf32, #tpu.memory_space<vmem>>, %arg4: memref<32x128xf32, #tpu.memory_space<vmem>>, %arg5: memref<1x128xf32, #tpu.memory_space<vmem>>, %arg6: memref<128x128xf32, #tpu.memory_space<vmem>>, %arg7: memref<1x128xf32, #tpu.memory_space<vmem>>, %arg8: memref<128x128xf32, #tpu.memory_space<vmem>>, %arg9: memref<1x128xf32, #tpu.memory_space<vmem>>, %arg10: memref<8x128xf32, #tpu.memory_space<vmem>>) attributes {dimension_semantics = [#tpu.dimension_semantics<parallel>], iteration_bounds = array<i64: 1>, scalar_prefetch = 0 : i64, scratch_operands = 0 : i64, tpu.core_type = #tpu.core_type<tc>, window_params = [{transform_indices = @transform_0, window_bounds = array<i64: 8, 2>}, {pipeline_mode = #tpu.pipeline_mode<synchronous>, transform_indices = @transform_1, window_bounds = array<i64: 2, 32>}, {pipeline_mode = #tpu.pipeline_mode<synchronous>, transform_indices = @transform_2, window_bounds = array<i64: 32, 128>}, {pipeline_mode = #tpu.pipeline_mode<synchronous>, transform_indices = @transform_3, window_bounds = array<i64: 32, 128>}, {pipeline_mode = #tpu.pipeline_mode<synchronous>, transform_indices = @transform_4, window_bounds = array<i64: 1, 128>}, {pipeline_mode = #tpu.pipeline_mode<synchronous>, transform_indices = @transform_5, window_bounds = array<i64: 128, 128>}, {pipeline_mode = #tpu.pipeline_mode<synchronous>, transform_indices = @transform_6, window_bounds = array<i64: 1, 128>}, {pipeline_mode = #tpu.pipeline_mode<synchronous>, transform_indices = @transform_7, window_bounds = array<i64: 128, 128>}, {pipeline_mode = #tpu.pipeline_mode<synchronous>, transform_indices = @transform_8, window_bounds = array<i64: 1, 128>}, {transform_indices = @transform_9, window_bounds = array<i64: 8, 128>}]} {
    %c0 = arith.constant 0 : index
    %c0_0 = arith.constant 0 : index
    %0 = vector.load %arg1[%c0, %c0_0] : memref<8x2xf32, #tpu.memory_space<vmem>>, vector<8x2xf32>
    %c0_1 = arith.constant 0 : index
    %c0_2 = arith.constant 0 : index
    %1 = vector.load %arg2[%c0_1, %c0_2] : memref<2x32xf32, #tpu.memory_space<vmem>>, vector<2x32xf32>
    %2 = vector.extract_strided_slice %0 {offsets = [0, 0], sizes = [8, 1], strides = [1, 1]} : vector<8x2xf32> to vector<8x1xf32>
    %3 = vector.extract_strided_slice %1 {offsets = [0, 0], sizes = [1, 32], strides = [1, 1]} : vector<2x32xf32> to vector<1x32xf32>
    %4 = vector.broadcast %2 : vector<8x1xf32> to vector<8x32xf32>
    %5 = vector.broadcast %3 : vector<1x32xf32> to vector<8x32xf32>
    %6 = arith.mulf %4, %5 : vector<8x32xf32>
    %7 = vector.extract_strided_slice %0 {offsets = [0, 1], sizes = [8, 1], strides = [1, 1]} : vector<8x2xf32> to vector<8x1xf32>
    %8 = vector.extract_strided_slice %1 {offsets = [1, 0], sizes = [1, 32], strides = [1, 1]} : vector<2x32xf32> to vector<1x32xf32>
    %9 = vector.broadcast %7 : vector<8x1xf32> to vector<8x32xf32>
    %10 = vector.broadcast %8 : vector<1x32xf32> to vector<8x32xf32>
    %11 = arith.mulf %9, %10 : vector<8x32xf32>
    %12 = arith.addf %6, %11 : vector<8x32xf32>
    %13 = math.sin %12 : vector<8x32xf32>
    %14 = math.cos %12 : vector<8x32xf32>
    %c0_3 = arith.constant 0 : index
    %c0_4 = arith.constant 0 : index
    %15 = vector.load %arg3[%c0_3, %c0_4] : memref<32x128xf32, #tpu.memory_space<vmem>>, vector<32x128xf32>
    %cst = arith.constant dense<0.000000e+00> : vector<8x128xf32>
    %16 = tpu.matmul %13, %15, %cst {dimension_numbers = #tpu.dot_dimension_numbers<[1], [0], [0], [1], [0, 0, 1, 1], [], []>} : vector<8x32xf32>, vector<32x128xf32>, vector<8x128xf32> -> vector<8x128xf32>
    %c0_5 = arith.constant 0 : index
    %c0_6 = arith.constant 0 : index
    %17 = vector.load %arg4[%c0_5, %c0_6] : memref<32x128xf32, #tpu.memory_space<vmem>>, vector<32x128xf32>
    %cst_7 = arith.constant dense<0.000000e+00> : vector<8x128xf32>
    %18 = tpu.matmul %14, %17, %cst_7 {dimension_numbers = #tpu.dot_dimension_numbers<[1], [0], [0], [1], [0, 0, 1, 1], [], []>} : vector<8x32xf32>, vector<32x128xf32>, vector<8x128xf32> -> vector<8x128xf32>
    %19 = arith.addf %16, %18 : vector<8x128xf32>
    %c0_8 = arith.constant 0 : index
    %c0_9 = arith.constant 0 : index
    %20 = vector.load %arg5[%c0_8, %c0_9] : memref<1x128xf32, #tpu.memory_space<vmem>>, vector<1x128xf32>
    %21 = vector.broadcast %20 : vector<1x128xf32> to vector<8x128xf32>
    %22 = arith.addf %19, %21 : vector<8x128xf32>
    %cst_10 = arith.constant 0.000000e+00 : f32
    %23 = vector.broadcast %cst_10 : f32 to vector<8x128xf32>
    %24 = arith.maximumf %22, %23 : vector<8x128xf32>
    %c0_11 = arith.constant 0 : index
    %c0_12 = arith.constant 0 : index
    %25 = vector.load %arg6[%c0_11, %c0_12] : memref<128x128xf32, #tpu.memory_space<vmem>>, vector<128x128xf32>
    %cst_13 = arith.constant dense<0.000000e+00> : vector<8x128xf32>
    %26 = tpu.matmul %24, %25, %cst_13 {dimension_numbers = #tpu.dot_dimension_numbers<[1], [0], [0], [1], [0, 0, 1, 1], [], []>} : vector<8x128xf32>, vector<128x128xf32>, vector<8x128xf32> -> vector<8x128xf32>
    %c0_14 = arith.constant 0 : index
    %c0_15 = arith.constant 0 : index
    %27 = vector.load %arg7[%c0_14, %c0_15] : memref<1x128xf32, #tpu.memory_space<vmem>>, vector<1x128xf32>
    %28 = vector.broadcast %27 : vector<1x128xf32> to vector<8x128xf32>
    %29 = arith.addf %26, %28 : vector<8x128xf32>
    %cst_16 = arith.constant 0.000000e+00 : f32
    %30 = vector.broadcast %cst_16 : f32 to vector<8x128xf32>
    %31 = arith.maximumf %29, %30 : vector<8x128xf32>
    %c0_17 = arith.constant 0 : index
    %c0_18 = arith.constant 0 : index
    %32 = vector.load %arg8[%c0_17, %c0_18] : memref<128x128xf32, #tpu.memory_space<vmem>>, vector<128x128xf32>
    %cst_19 = arith.constant dense<0.000000e+00> : vector<8x128xf32>
    %33 = tpu.matmul %31, %32, %cst_19 {dimension_numbers = #tpu.dot_dimension_numbers<[1], [0], [0], [1], [0, 0, 1, 1], [], []>} : vector<8x128xf32>, vector<128x128xf32>, vector<8x128xf32> -> vector<8x128xf32>
    %c0_20 = arith.constant 0 : index
    %c0_21 = arith.constant 0 : index
    %34 = vector.load %arg9[%c0_20, %c0_21] : memref<1x128xf32, #tpu.memory_space<vmem>>, vector<1x128xf32>
    %35 = vector.broadcast %34 : vector<1x128xf32> to vector<8x128xf32>
    %36 = arith.addf %33, %35 : vector<8x128xf32>
    %cst_22 = arith.constant dense<0xFF800000> : vector<8xf32>
    %37 = vector.multi_reduction <maximumf>, %36, %cst_22 [1] : vector<8x128xf32> to vector<8xf32>
    %38 = vector.shape_cast %37 : vector<8xf32> to vector<8x1xf32>
    %39 = vector.broadcast %38 : vector<8x1xf32> to vector<8x128xf32>
    %40 = arith.subf %36, %39 : vector<8x128xf32>
    %41 = math.exp %40 : vector<8x128xf32>
    %cst_23 = arith.constant dense<0.000000e+00> : vector<8xf32>
    %42 = vector.multi_reduction <add>, %41, %cst_23 [1] : vector<8x128xf32> to vector<8xf32>
    %43 = vector.shape_cast %42 : vector<8xf32> to vector<8x1xf32>
    %44 = tpu.reciprocal %43 : vector<8x1xf32> -> vector<8x1xf32>
    %45 = vector.broadcast %44 : vector<8x1xf32> to vector<8x128xf32>
    %46 = arith.mulf %41, %45 : vector<8x128xf32>
    %c0_24 = arith.constant 0 : index
    %c0_25 = arith.constant 0 : index
    %47 = vector.load %arg10[%c0_24, %c0_25] : memref<8x128xf32, #tpu.memory_space<vmem>>, vector<8x128xf32>
    tpu.vector_store %arg10[%c0_24, %c0_25], %46 {strides = array<i32>} : memref<8x128xf32, #tpu.memory_space<vmem>>, vector<8x128xf32>,
    return
  }
  func.func @transform_0(%arg0: i32) -> (i32, i32) {
    %c0_i32 = arith.constant 0 : i32
    %c0_i32_0 = arith.constant 0 : i32
    return %arg0, %c0_i32 : i32, i32
  }
  func.func @transform_1(%arg0: i32) -> (i32, i32) {
    %c0_i32 = arith.constant 0 : i32
    %c0_i32_0 = arith.constant 0 : i32
    %c0_i32_1 = arith.constant 0 : i32
    return %c0_i32, %c0_i32_0 : i32, i32
  }
  func.func @transform_2(%arg0: i32) -> (i32, i32) {
    %c0_i32 = arith.constant 0 : i32
    %c0_i32_0 = arith.constant 0 : i32
    %c0_i32_1 = arith.constant 0 : i32
    return %c0_i32, %c0_i32_0 : i32, i32
  }
  func.func @transform_3(%arg0: i32) -> (i32, i32) {
    %c0_i32 = arith.constant 0 : i32
    %c0_i32_0 = arith.constant 0 : i32
    %c0_i32_1 = arith.constant 0 : i32
    return %c0_i32, %c0_i32_0 : i32, i32
  }
  func.func @transform_4(%arg0: i32) -> (i32, i32) {
    %c0_i32 = arith.constant 0 : i32
    %c0_i32_0 = arith.constant 0 : i32
    %c0_i32_1 = arith.constant 0 : i32
    return %c0_i32, %c0_i32_0 : i32, i32
  }
  func.func @transform_5(%arg0: i32) -> (i32, i32) {
    %c0_i32 = arith.constant 0 : i32
    %c0_i32_0 = arith.constant 0 : i32
    %c0_i32_1 = arith.constant 0 : i32
    return %c0_i32, %c0_i32_0 : i32, i32
  }
  func.func @transform_6(%arg0: i32) -> (i32, i32) {
    %c0_i32 = arith.constant 0 : i32
    %c0_i32_0 = arith.constant 0 : i32
    %c0_i32_1 = arith.constant 0 : i32
    return %c0_i32, %c0_i32_0 : i32, i32
  }
  func.func @transform_7(%arg0: i32) -> (i32, i32) {
    %c0_i32 = arith.constant 0 : i32
    %c0_i32_0 = arith.constant 0 : i32
    %c0_i32_1 = arith.constant 0 : i32
    return %c0_i32, %c0_i32_0 : i32, i32
  }
  func.func @transform_8(%arg0: i32) -> (i32, i32) {
    %c0_i32 = arith.constant 0 : i32
    %c0_i32_0 = arith.constant 0 : i32
    %c0_i32_1 = arith.constant 0 : i32
    return %c0_i32, %c0_i32_0 : i32, i32
  }
  func.func @transform_9(%arg0: i32) -> (i32, i32) {
    %c0_i32 = arith.constant 0 : i32
    %c0_i32_0 = arith.constant 0 : i32
    return %arg0, %c0_i32 : i32, i32
  }
}

</mosaic_0001>

<bundles_post_ra>
// kernel: tpu_custom_call.1
= control target key start
LH: loop header
LB: loop body
LE: loop exit
PB: predicated region body
PF: predicated region fallthrough
CT: control target
= control target key end

     0   :  { %14 = vsyncpa [#allocation3], 0  ;;  %s1163_s0 = inlined_call_operand.vmem [shape: f32[8,2], index: 0, kind: input, shape index: {}]   ;;  %s1164_s1 = inlined_call_operand.vmem [shape: f32[2,32], index: 1, kind: input, shape index: {}]   ;;  %s1165_s2 = inlined_call_operand.hbm [shape: f32[32,128], index: 2, kind: input, shape index: {}]   ;;  %s1166_s3 = inlined_call_operand.hbm [shape: f32[32,128], index: 3, kind: input, shape index: {}]   ;;  %s1167_s4 = inlined_call_operand.vmem [shape: f32[1,128], index: 4, kind: input, shape index: {}]   ;;  %s1168_s5 = inlined_call_operand.hbm [shape: f32[128,128], index: 5, kind: input, shape index: {}]   ;;  %s1169_s6 = inlined_call_operand.vmem [shape: f32[1,128], index: 6, kind: input, shape index: {}]   ;;  %s1170_s7 = inlined_call_operand.hbm [shape: f32[128,128], index: 7, kind: input, shape index: {}]   ;;  %s1171_s8 = inlined_call_operand.vmem [shape: f32[1,128], index: 8, kind: input, shape index: {}]   ;;  %s1172_s9 = inlined_call_operand.hbm [shape: f32[8,128], index: 9, kind: output, shape index: {}]  }
   0x1   :  { %15 = vsyncpa [#allocation6], 0 }
   0x2   :  { %16 = vsyncpa [#allocation9], 0 }
   0x3   :  { %17 = vsyncpa [#allocation4], 0  ;;  %s983_s30 = smov [#allocation5]   ;;  %s984_s11 = smov [#allocation2]  }
   0x4   :  { %s39_s10 = sshll.u32 %s983_s30, 4  ;;  %s27_s12 = sshll.u32 %s984_s11, 4  ;;  %s40_s10 = int_to_ptr.vmem [resolvable:$true] %s39_s10  ;;  %s28_s12 = int_to_ptr.vmem [resolvable:$true] %s27_s12 }
   0x5   :  { %s883_s13 = scalar_lea.vmem %s40_s10, 512  ;;  %p888_p1 = scmp.lt.s32.totalorder %s40_s10, %s40_s10 }
   0x6   :  { %p884_p0 = scmp.ne.s32.totalorder %s40_s10, %s883_s13  ;;  %p889_p2 = scmp.lt.s32.totalorder %s883_s13, %s883_s13 }
   0x8   :  { %p890_p3 = por %p889_p2, %p888_p1 }
   0xa   :  { %p891_p4 = pnand %p890_p3, %p884_p0 }
   0xc   :  { %894 = shalt.err (!%p891_p4)
}
   0xd   :  { %s985_s14 = smov 128   ;;  %s986_s15 = smov 8  }
   0xe   :  { %45 = dma.hbm_to_vmem [thread:$0]  %s1166_s3, 512, %s40_s10, [#allocation6], %s985_s14, %s985_s14, %s986_s15  }
   0xf   :  { %s903_s18 = scalar_lea.vmem %s28_s12, 512  ;;  %p908_p6 = scmp.lt.s32.totalorder %s28_s12, %s28_s12 }
  0x10   :  { %p904_p5 = scmp.ne.s32.totalorder %s28_s12, %s903_s18  ;;  %p909_p7 = scmp.lt.s32.totalorder %s903_s18, %s903_s18 }
  0x12   :  { %p910_p8 = por %p909_p7, %p908_p6 }
  0x14   :  { %p911_p9 = pnand %p910_p8, %p904_p5 }
  0x16   :  { %914 = shalt.err (!%p911_p9)
}
  0x17   :  { %33 = dma.hbm_to_vmem [thread:$0]  %s1165_s2, 512, %s28_s12, [#allocation3], %s985_s14, %s985_s14, %s986_s15  }
  0x18   :  { %s987_s21 = smov [#allocation7]   ;;  %s988_s23 = smov [#allocation8]  }
  0x19   :  { %s53_s22 = sshll.u32 %s987_s21, 4  ;;  %s67_s24 = sshll.u32 %s988_s23, 4  ;;  %s54_s22 = int_to_ptr.vmem [resolvable:$true] %s53_s22  ;;  %s68_s24 = int_to_ptr.vmem [resolvable:$true] %s67_s24 }
  0x1a   :  { %s923_s3 = scalar_lea.vmem %s54_s22, 2048  ;;  %p928_p11 = scmp.lt.s32.totalorder %s54_s22, %s54_s22 }
  0x1b   :  { %p924_p10 = scmp.ne.s32.totalorder %s54_s22, %s923_s3  ;;  %p929_p12 = scmp.lt.s32.totalorder %s923_s3, %s923_s3 }
  0x1d   :  { %p930_p13 = por %p929_p12, %p928_p11 }
  0x1f   :  { %p931_p0 = pnand %p930_p13, %p924_p10 }
  0x21   :  { %934 = shalt.err (!%p931_p0)
}
  0x22   :  { %59 = dma.hbm_to_vmem [thread:$0]  %s1168_s5, 2048, %s54_s22, [#allocation6], %s985_s14, %s985_s14, %s986_s15  }
  0x23   :  { %s943_s2 = scalar_lea.vmem %s68_s24, 2048  ;;  %p948_p2 = scmp.lt.s32.totalorder %s68_s24, %s68_s24 }
  0x24   :  { %p944_p1 = scmp.ne.s32.totalorder %s68_s24, %s943_s2  ;;  %p949_p3 = scmp.lt.s32.totalorder %s943_s2, %s943_s2 }
  0x26   :  { %p950_p4 = por %p949_p3, %p948_p2 }
  0x28   :  { %p951_p5 = pnand %p950_p4, %p944_p1 }
  0x2a   :  { %954 = shalt.err (!%p951_p5)
}
  0x2b   :  { %73 = dma.hbm_to_vmem [thread:$0]  %s1170_s7, 2048, %s68_s24, [#allocation9], %s985_s14, %s985_s14, %s986_s15  }
  0x2c   :  { %975 = dma.done.wait [#allocation3], 512  }
  0x2d   :  { %976 = vsyncadd [#allocation3], 4294966784 }
  0x2e   :  { %977 = dma.done.wait [#allocation6], 2560  }
  0x2f   :  { %978 = vsyncadd [#allocation6], 4294964736 }
  0x30   :  { %979 = dma.done.wait [#allocation9], 2048  }
  0x31   :  { %980 = vsyncadd [#allocation9], 4294965248  ;;  %v989_v0 = vmov 0   ;;  %v88_v1 = vld [vmem:[%s1163_s0] sm:$0xff]  ;;  %v990_v2 = vmov 1   ;;  %v324_v3 = vld [vmem:[#allocation5 + $0x18] sm:$0xff]  ;;  %v95_v12 = vlaneseq }
  0x32   :  { %865 = vset.pattern.permute.xlu0 %v989_v0  ;;  %v320_v4 = vld [vmem:[#allocation2 + $0x18] sm:$0xff]  ;;  %v991_v5 = vmov 0.0   ;;  %v323_v6 = vld [vmem:[#allocation5 + $0x10] sm:$0xff]  ;;  %v322_v8 = vld [vmem:[#allocation5 + $0x8] sm:$0xff]  ;;  %vm992_vm0 = vmmov 0   ;;  %vm325_vm11 = vcmask 261120  }
  0x33   :  { %92 = vperm.xlu0 %865, %v88_v1   ;;  %752 = vmatprep.subr.mxu0 %v991_v5  ;;  %v319_v7 = vld [vmem:[#allocation2 + $0x10] sm:$0xff]  ;;  %v318_v9 = vld [vmem:[#allocation2 + $0x8] sm:$0xff]  ;;  %v321_v10 = vld [vmem:[#allocation5] sm:$0xff]  ;;  %v96_v13 = vshrl.u32 %v95_v12, 7  ;;  %v993_v34 = vmov 683565275  }
  0x34   :  { %763 = vmatprep.subr.mxu1 %v991_v5  ;;  %753 = vmatpush3.msra.mxu0 %v324_v3  ;;  %v317_v11 = vld [vmem:[#allocation2] sm:$0xff]  ;;  %v994_v36 = vmov 2475754826   ;;  %v995_v39 = vmov 2131351028  }
  0x35   :  { %764 = vmatpush3.msra.mxu1 %v320_v4  ;;  %754 = vmatprep.subr.mxu0 %v991_v5  ;;  %v97_v14 = vsub.s32 0, %v96_v13  ;;  %v106_v15 = vsub.s32 1, %v96_v13  ;;  %v89_v16 = vld [vmem:[%s1164_s1] sm:$0x3]  ;;  %v996_v42 = vmov 2102212464  }
  0x36   :  { %765 = vmatprep.subr.mxu1 %v991_v5  ;;  %755 = vmatpush3.msra.mxu0 %v323_v6  ;;  %v997_v45 = vmov 920167782   ;;  %v998_v48 = vmov 1326507024  }
  0x37   :  { %866 = vset.pattern.permute.xlu0 %v990_v2  ;;  %766 = vmatpush3.msra.mxu1 %v319_v7  ;;  %v98_v18 = vrot.slane %v89_v16, %v97_v14  ;;  %v107_v19 = vrot.slane %v89_v16, %v106_v15 }
  0x38   :  { %101 = vperm.xlu0 %866, %v88_v1   ;;  %756 = vmatprep.subr.mxu0 %v991_v5 }
  0x39   :  { %767 = vmatprep.subr.mxu1 %v991_v5  ;;  %757 = vmatpush3.msra.mxu0 %v322_v8 }
  0x3a   :  { %768 = vmatpush3.msra.mxu1 %v318_v9  ;;  %758 = vmatprep.subr.mxu0 %v991_v5 }
  0x3b   :  { %769 = vmatprep.subr.mxu1 %v991_v5  ;;  %759 = vmatpush3.msra.mxu0 %v321_v10 }
  0x3c   :  { %760 = vmatprep.mubr.msk.f32.mxu0 %vm992_vm0, %v991_v5  ;;  %770 = vmatpush3.msra.mxu1 %v317_v11 }
  0x3d   :  { %771 = vmatprep.mubr.msk.f32.mxu1 %vm992_vm0, %v991_v5  ;;  %774 = vmatprep.subr.mxu0 %v991_v5 }
  0x3e   :  { %809 = vmatprep.subr.mxu1 %v991_v5 }
  0xae   :  { %v93_v17 = vpop.permute.xlu0 %92 }
  0xaf   :  { %v99_v21 = vmul.f32 %v98_v18, %v93_v17 }
  0xb3   :  { %v102_v20 = vpop.permute.xlu0 %101 }
  0xb4   :  { %v108_v22 = vmul.f32 %v107_v19, %v102_v20 }
  0xb6   :  { %v1094_v23 = vadd.f32 %v108_v22, %v99_v21 }
  0xb8   :  { %v113_v24 = vand.u32 2139095040, %v1094_v23  ;;  %v110_v28 = vand.u32 2147483647, %v1094_v23  ;;  %vm112_vm8 = vcmp.lt.s32.totalorder %v1094_v23, 0 }
  0xba   :  { %v114_v25 = vshrl.u32 %v113_v24, 23  ;;  %v117_v31 = vand.u32 8388607, %v110_v28  ;;  %vm111_vm9 = vcmp.le.f32.partialorder %v110_v28, 0.7853982 }
  0xbc   :  { %v695_v26 = vadd.s32 4294967169, %v114_v25  ;;  %v118_v50 = vor.u32 8388608, %v117_v31 }
  0xbe   :  { %v120_v27 = vadd.s32 1, %v695_v26  ;;  %v158_v0 = vshll.u32 %v118_v50, 8 }
  0xc0   :  { %vm121_vm1 = vcmp.gt.s32.totalorder %v120_v27, 0 }
  0xc1   :  { %v122_v29 = vsel %vm121_vm1, %v120_v27, 0 }
  0xc2   :  { %v124_v30 = vand.u32 31, %v122_v29  ;;  %v123_v33 = vshrl.u32 %v122_v29, 5 }
  0xc4   :  { %v125_v32 = vsub.s32 32, %v124_v30  ;;  %v127_v35 = vshll.u32 %v993_v34, %v124_v30  ;;  %v130_v37 = vshll.u32 %v994_v36, %v124_v30  ;;  %v133_v41 = vshll.u32 %v995_v39, %v124_v30 }
  0xc5   :  { %v136_v44 = vshll.u32 %v996_v42, %v124_v30  ;;  %v139_v47 = vshll.u32 %v997_v45, %v124_v30  ;;  %vm142_vm2 = vcmp.lt.s32.totalorder %v123_v33, 1  ;;  %vm145_vm3 = vcmp.lt.s32.totalorder %v123_v33, 4 }
  0xc6   :  { %v128_v38 = vshrl.u32 %v994_v36, %v125_v32  ;;  %v131_v40 = vshrl.u32 %v995_v39, %v125_v32  ;;  %v134_v43 = vshrl.u32 %v996_v42, %v125_v32  ;;  %v137_v46 = vshrl.u32 %v997_v45, %v125_v32 }
  0xc7   :  { %v140_v49 = vshrl.u32 %v998_v48, %v125_v32  ;;  %v126_v59 = vshrl.u32 %v993_v34, %v125_v32  ;;  %vm144_vm4 = vcmp.lt.s32.totalorder %v123_v33, 3  ;;  %vm143_vm5 = vcmp.lt.s32.totalorder %v123_v33, 2 }
  0xc8   :  { %v129_v51 = vor.u32 %v128_v38, %v127_v35  ;;  %v132_v52 = vor.u32 %v131_v40, %v130_v37  ;;  %v135_v53 = vor.u32 %v134_v43, %v133_v41  ;;  %v138_v54 = vor.u32 %v137_v46, %v136_v44 }
  0xc9   :  { %v141_v55 = vor.u32 %v140_v49, %v139_v47 }
  0xca   :  { %v147_v56 = vsel %vm145_vm3, %v135_v53, 2102212464  ;;  %v150_v57 = vsel %vm142_vm2, %v129_v51, %v132_v52  ;;  %v154_v58 = vsel %vm142_vm2, %v132_v52, %v135_v53  ;;  %v151_v60 = vsel %vm145_vm3, %v138_v54, 920167782 }
  0xcb   :  { %v155_v61 = vsel %vm145_vm3, %v141_v55, 1326507024  ;;  %v152_v62 = vsel %vm144_vm4, %v135_v53, %v151_v60  ;;  %v146_v1 = vsel %vm142_vm2, %v126_v59, %v129_v51  ;;  %v148_v2 = vsel %vm144_vm4, %v132_v52, %v147_v56  ;;  %v496_v56 = vld [vmem:[#allocation7 + $0x78] sm:$0xff]  ;;  %v495_v59 = vld [vmem:[#allocation7 + $0x70] sm:$0xff]  ;;  %v494_v60 = vld [vmem:[#allocation7 + $0x68] sm:$0xff] }
  0xcc   :  { %v156_v63 = vsel %vm144_vm4, %v138_v54, %v155_v61  ;;  %v153_v3 = vsel %vm143_vm5, %v150_v57, %v152_v62  ;;  %v149_v10 = vsel %vm143_vm5, %v146_v1, %v148_v2  ;;  %vm202_vm2 = vweird.f32 %v1094_v23  ;;  %v492_v61 = vld [vmem:[#allocation7 + $0x58] sm:$0xff]  ;;  %v491_v62 = vld [vmem:[#allocation7 + $0x50] sm:$0xff] }
  0xcd   :  { %v157_v4 = vsel %vm143_vm5, %v154_v58, %v156_v63  ;;  %v1103_v8 = vmul.u32.u64.low %v158_v0, %v153_v3  ;;  %v1104_v9 = vmul.u32.u64.high %v158_v0, %v153_v3, %v1103_v8  ;;  %v165_v12 = vmul.u32 %v158_v0, %v149_v10  ;;  %v490_v63 = vld [vmem:[#allocation7 + $0x48] sm:$0xff]  ;;  %v488_v1 = vld [vmem:[#allocation7 + $0x38] sm:$0xff]  ;;  %v487_v2 = vld [vmem:[#allocation7 + $0x30] sm:$0xff] }
  0xce   :  { %v1100_v6 = vmul.u32.u64.low %v158_v0, %v157_v4  ;;  %v1101_v7 = vmul.u32.u64.high %v158_v0, %v157_v4, %v1100_v6  ;;  %v489_v0 = vld [vmem:[#allocation7 + $0x40] sm:$0xff]  ;;  %v486_v3 = vld [vmem:[#allocation7 + $0x28] sm:$0xff]  ;;  %v590_v10 = vld [vmem:[#allocation8 + $0x78] sm:$0xff] }
  0xcf   :  { %v168_v11 = vadd.s32 1, %v1104_v9  ;;  %v485_v4 = vld [vmem:[#allocation7 + $0x20] sm:$0xff]  ;;  %v484_v6 = vld [vmem:[#allocation7 + $0x18] sm:$0xff] }
  0xd0   :  { %vm167_vm6 = vc.u32 %v1101_v7, %v1103_v8  ;;  %v166_v25 = vadd.s32 %v1103_v8, %v1101_v7  ;;  %v483_v7 = vld [vmem:[#allocation7 + $0x10] sm:$0xff]  ;;  %v482_v8 = vld [vmem:[#allocation7 + $0x8] sm:$0xff] }
  0xd1   :  { %v169_v13 = vsel %vm167_vm6, %v168_v11, %v1104_v9  ;;  %v481_v9 = vld [vmem:[#allocation7] sm:$0xff]  ;;  %v589_v11 = vld [vmem:[#allocation8 + $0x70] sm:$0xff] }
  0xd2   :  { %v170_v14 = vadd.s32 %v169_v13, %v165_v12  ;;  %v588_v12 = vld [vmem:[#allocation8 + $0x68] sm:$0xff]  ;;  %v587_v13 = vld [vmem:[#allocation8 + $0x60] sm:$0xff] }
  0xd4   :  { %v171_v15 = vadd.s32 536870912, %v170_v14 }
  0xd6   :  { %v172_v16 = vshrl.u32 %v171_v15, 30  ;;  %v585_v15 = vld [vmem:[#allocation8 + $0x50] sm:$0xff] }
  0xd8   :  { %v173_v17 = vshll.u32 %v172_v16, 30  ;;  %v196_v39 = vsub.s32 4, %v172_v16 }
  0xda   :  { %v174_v18 = vsub.s32 %v170_v14, %v173_v17  ;;  %v197_v42 = vsel %vm112_vm8, %v196_v39, %v172_v16  ;;  %v586_v14 = vld [vmem:[#allocation8 + $0x58] sm:$0xff]  ;;  %v584_v16 = vld [vmem:[#allocation8 + $0x48] sm:$0xff]  ;;  %v583_v17 = vld [vmem:[#allocation8 + $0x40] sm:$0xff] }
  0xdb   :  { %v199_v43 = vsel %vm111_vm9, 0, %v197_v42 }
  0xdc   :  { %v176_v19 = vsub.s32 0, %v174_v18  ;;  %v203_v44 = vadd.s32 3, %v199_v43  ;;  %v307_v45 = vand.u32 3, %v199_v43 }
  0xde   :  { %v696_v20 = vmin.u32 %v176_v19, %v174_v18  ;;  %v204_v46 = vand.u32 3, %v203_v44  ;;  %vm312_vm10 = vcmp.eq.s32.totalorder %v307_v45, 2  ;;  %vm309_vm13 = vcmp.eq.s32.totalorder %v307_v45, 0  ;;  %v581_v19 = vld [vmem:[#allocation8 + $0x30] sm:$0xff] }
  0xdf   :  { %vm308_vm15 = vcmp.lt.s32.totalorder %v307_v45, 2 }
  0xe0   :  { %v178_v21 = vclz %v696_v20  ;;  %vm209_vm12 = vcmp.eq.s32.totalorder %v204_v46, 2  ;;  %vm206_vm14 = vcmp.eq.s32.totalorder %v204_v46, 0  ;;  %vm205_vm1 = vcmp.lt.s32.totalorder %v204_v46, 2  ;;  %v580_v20 = vld [vmem:[#allocation8 + $0x28] sm:$0xff] }
  0xe2   :  { %v697_v22 = vadd.s32 4294967294, %v178_v21  ;;  %v579_v21 = vld [vmem:[#allocation8 + $0x20] sm:$0xff] }
  0xe4   :  { %vm698_vm7 = vcmp.lt.s32.totalorder %v697_v22, 0 }
  0xe5   :  { %v181_v24 = vsel %vm698_vm7, 0, %v697_v22  ;;  %v578_v22 = vld [vmem:[#allocation8 + $0x18] sm:$0xff] }
  0xe6   :  { %v182_v26 = vsub.s32 32, %v181_v24  ;;  %v186_v27 = vsub.s32 4294967266, %v181_v24  ;;  %v183_v29 = vshll.u32 %v174_v18, %v181_v24  ;;  %v582_v18 = vld [vmem:[#allocation8 + $0x38] sm:$0xff] }
  0xe8   :  { %v184_v30 = vshrl.u32 %v166_v25, %v182_v26  ;;  %v187_v31 = vadd.s32 127, %v186_v27  ;;  %v705_v26 = vld [vmem:[%s1167_s4] ss:$0 sm:$0xff] }
  0xea   :  { %v185_v32 = vor.u32 %v184_v30, %v183_v29  ;;  %v188_v33 = vshll.u32 %v187_v31, 23 }
  0xec   :  { %v189_v34 = vor.u32 4788187, %v188_v33  ;;  %v192_v36 = vcvt.s32.f32 %v185_v32  ;;  %v577_v33 = vld [vmem:[#allocation8 + $0x10] sm:$0xff] }
  0xee   :  { %v190_v35 = vand.u32 2147483647, %v189_v34  ;;  %v576_v34 = vld [vmem:[#allocation8 + $0x8] sm:$0xff] }
  0xf0   :  { %v193_v37 = vmul.f32 %v192_v36, %v190_v35  ;;  %v575_v35 = vld [vmem:[#allocation8] sm:$0xff] }
  0xf1   :  { %v706_v36 = vld [vmem:[%s1169_s6] ss:$0 sm:$0xff]  ;;  %s999_s6 = smov [#allocation10]  }
  0xf2   :  { %v194_v38 = vxor.u32 2147483648, %v193_v37  ;;  %s684_s13 = sshll.u32 %s999_s6, 4  ;;  %s685_s13 = int_to_ptr.vmem [resolvable:$true] %s684_s13 }
  0xf3   :  { %s955_s14 = scalar_lea.vmem %s685_s13, 128  ;;  %p960_p7 = scmp.lt.s32.totalorder %s685_s13, %s685_s13 }
  0xf4   :  { %v195_v40 = vsel %vm112_vm8, %v194_v38, %v193_v37  ;;  %p956_p6 = scmp.ne.s32.totalorder %s685_s13, %s955_s14  ;;  %p961_p8 = scmp.lt.s32.totalorder %s955_s14, %s955_s14 }
  0xf5   :  { %v198_v41 = vsel %vm111_vm9, %v1094_v23, %v195_v40  ;;  %v493_v23 = vld [vmem:[#allocation7 + $0x60] sm:$0xff] }
  0xf6   :  { %867 = vcosq.f32 %v198_v41  ;;  %p962_p9 = por %p961_p8, %p960_p7 }
  0xf7   :  { %869 = vsinq.f32 %v198_v41  ;;  %v707_v41 = vld [vmem:[%s1171_s8] ss:$0 sm:$0xff] }
  0xf8   :  { %p963_p10 = pnand %p962_p9, %p956_p6 }
 0x103   :  { %v868_v47 = vpop.eup %867 }
 0x104   :  { %v870_v48 = vpop.eup %869  ;;  %v210_v49 = vxor.u32 2147483648, %v868_v47 }
 0x105   :  { %v207_v50 = vxor.u32 2147483648, %v870_v48 }
 0x106   :  { %v314_v51 = vsel %vm312_vm10, %v210_v49, %v870_v48  ;;  %v211_v28 = vsel %vm209_vm12, %v210_v49, %v870_v48 }
 0x107   :  { %v311_v52 = vsel %vm309_vm13, %v868_v47, %v207_v50  ;;  %v208_v53 = vsel %vm206_vm14, %v868_v47, %v207_v50 }
 0x108   :  { %v315_v54 = vsel %vm308_vm15, %v311_v52, %v314_v51  ;;  %v212_v55 = vsel %vm205_vm1, %v208_v53, %v211_v28 }
 0x109   :  { %v316_v57 = vsel %vm202_vm2, nan, %v315_v54  ;;  %v213_v58 = vsel %vm202_vm2, nan, %v212_v55 }
 0x10a   :  { %761 = vmatmul.mubr.msk.f32.vlgmr.msra.gmra.mxu0 %vm325_vm11, %v316_v57  ;;  %772 = vmatmul.mubr.msk.f32.vlgmr.msra.gmra.mxu1 %vm325_vm11, %v213_v58 }
 0x10b   :  { %775 = vmatpush3.msra.mxu0 %v496_v56  ;;  %806 = vmatprep.mubr.msk.f32.mxu0 %vm992_vm0, %v991_v5 }
 0x10c   :  { %776 = vmatprep.subr.mxu0 %v991_v5  ;;  %841 = vmatprep.mubr.msk.f32.mxu1 %vm992_vm0, %v991_v5 }
 0x10d   :  { %777 = vmatpush3.msra.mxu0 %v495_v59  ;;  %810 = vmatpush3.msra.mxu1 %v590_v10 }
 0x10e   :  { %778 = vmatprep.subr.mxu0 %v991_v5  ;;  %811 = vmatprep.subr.mxu1 %v991_v5 }
 0x10f   :  { %779 = vmatpush3.msra.mxu0 %v494_v60  ;;  %812 = vmatpush3.msra.mxu1 %v589_v11 }
 0x110   :  { %780 = vmatprep.subr.mxu0 %v991_v5  ;;  %813 = vmatprep.subr.mxu1 %v991_v5 }
 0x111   :  { %781 = vmatpush3.msra.mxu0 %v493_v23  ;;  %814 = vmatpush3.msra.mxu1 %v588_v12 }
 0x112   :  { %782 = vmatprep.subr.mxu0 %v991_v5  ;;  %815 = vmatprep.subr.mxu1 %v991_v5 }
 0x113   :  { %783 = vmatpush3.msra.mxu0 %v492_v61  ;;  %816 = vmatpush3.msra.mxu1 %v587_v13 }
 0x114   :  { %784 = vmatprep.subr.mxu0 %v991_v5  ;;  %817 = vmatprep.subr.mxu1 %v991_v5 }
 0x115   :  { %785 = vmatpush3.msra.mxu0 %v491_v62  ;;  %818 = vmatpush3.msra.mxu1 %v586_v14 }
 0x116   :  { %786 = vmatprep.subr.mxu0 %v991_v5  ;;  %819 = vmatprep.subr.mxu1 %v991_v5 }
 0x117   :  { %787 = vmatpush3.msra.mxu0 %v490_v63  ;;  %820 = vmatpush3.msra.mxu1 %v585_v15 }
 0x118   :  { %788 = vmatprep.subr.mxu0 %v991_v5  ;;  %821 = vmatprep.subr.mxu1 %v991_v5 }
 0x119   :  { %789 = vmatpush3.msra.mxu0 %v489_v0  ;;  %822 = vmatpush3.msra.mxu1 %v584_v16 }
 0x11a   :  { %790 = vmatprep.subr.mxu0 %v991_v5  ;;  %823 = vmatprep.subr.mxu1 %v991_v5 }
 0x11b   :  { %791 = vmatpush3.msra.mxu0 %v488_v1  ;;  %824 = vmatpush3.msra.mxu1 %v583_v17 }
 0x11c   :  { %792 = vmatprep.subr.mxu0 %v991_v5  ;;  %825 = vmatprep.subr.mxu1 %v991_v5 }
 0x11d   :  { %793 = vmatpush3.msra.mxu0 %v487_v2  ;;  %826 = vmatpush3.msra.mxu1 %v582_v18 }
 0x11e   :  { %794 = vmatprep.subr.mxu0 %v991_v5  ;;  %827 = vmatprep.subr.mxu1 %v991_v5 }
 0x11f   :  { %795 = vmatpush3.msra.mxu0 %v486_v3  ;;  %828 = vmatpush3.msra.mxu1 %v581_v19 }
 0x120   :  { %796 = vmatprep.subr.mxu0 %v991_v5  ;;  %829 = vmatprep.subr.mxu1 %v991_v5 }
 0x121   :  { %797 = vmatpush3.msra.mxu0 %v485_v4  ;;  %830 = vmatpush3.msra.mxu1 %v580_v20 }
 0x122   :  { %798 = vmatprep.subr.mxu0 %v991_v5  ;;  %831 = vmatprep.subr.mxu1 %v991_v5 }
 0x123   :  { %799 = vmatpush3.msra.mxu0 %v484_v6  ;;  %832 = vmatpush3.msra.mxu1 %v579_v21 }
 0x124   :  { %800 = vmatprep.subr.mxu0 %v991_v5  ;;  %833 = vmatprep.subr.mxu1 %v991_v5 }
 0x125   :  { %801 = vmatpush3.msra.mxu0 %v483_v7  ;;  %834 = vmatpush3.msra.mxu1 %v578_v22 }
 0x126   :  { %802 = vmatprep.subr.mxu0 %v991_v5  ;;  %835 = vmatprep.subr.mxu1 %v991_v5 }
 0x127   :  { %803 = vmatpush3.msra.mxu0 %v482_v8  ;;  %836 = vmatpush3.msra.mxu1 %v577_v33 }
 0x128   :  { %804 = vmatprep.subr.mxu0 %v991_v5  ;;  %837 = vmatprep.subr.mxu1 %v991_v5 }
 0x129   :  { %805 = vmatpush3.msra.mxu0 %v481_v9  ;;  %838 = vmatpush3.msra.mxu1 %v576_v34 }
 0x12a   :  { %839 = vmatprep.subr.mxu1 %v991_v5 }
 0x12b   :  { %840 = vmatpush3.msra.mxu1 %v575_v35 }
 0x1ca   :  { %v395_v24 = vpop.f32.mrf.mxu0  ;;  %v468_v25 = vpop.f32.mrf.mxu1 }
 0x1cb   :  { %v469_v27 = vadd.f32 %v468_v25, %v395_v24 }
 0x1cc   :  { %v762_v29 = vpop.f32.mrf.mxu0  ;;  %v773_v30 = vpop.f32.mrf.mxu1 }
 0x1cd   :  { %v479_v31 = vadd.f32 %v705_v26, %v469_v27 }
 0x1cf   :  { %v480_v32 = vmax.f32 %v479_v31, 0.0 }
 0x1d1   :  { %807 = vmatmul.mubr.f32.vlgmr.msra.gmra.mxu0 %v480_v32 }
 0x291   :  { %v570_v37 = vpop.f32.mrf.mxu0 }
 0x292   :  { %v571_v38 = vadd.f32 %v706_v36, %v570_v37 }
 0x293   :  { %v808_v39 = vpop.f32.mrf.mxu0 }
 0x294   :  { %v574_v40 = vmax.f32 %v571_v38, 0.0 }
 0x296   :  { %842 = vmatmul.mubr.f32.vlgmr.msra.gmra.mxu1 %v574_v40 }
 0x356   :  { %v664_v42 = vpop.f32.mrf.mxu1 }
 0x357   :  { %v665_v43 = vadd.f32 %v707_v41, %v664_v42 }
 0x358   :  { %v843_v44 = vpop.f32.mrf.mxu1 }
 0x359   :  { %668 = vmax.xlane.f32.xlu1 %v665_v43 }
 0x3e2   :  { %v669_v45 = vpop.xlane.xlu1 %668 }
 0x3e3   :  { %v670_v5 = vsub.f32 %v665_v43, %v669_v45 }
 0x3e5   :  { %v671_v46 = vmul.f32 1.442695, %v670_v5 }
 0x3e7   :  { %871 = vpow2.f32 %v671_v46 }
 0x3f4   :  { %v872_v47 = vpop.eup %871 }
 0x3f5   :  { %673 = vadd.xlane.f32.xlu1 %v872_v47 }
 0x47e   :  { %v674_v48 = vpop.xlane.xlu1 %673 }
 0x47f   :  { %873 = vrcp.f32 %v674_v48 }
 0x48c   :  { %v874_v49 = vpop.eup %873 }
 0x48d   :  { %v676_v50 = vmul.f32 %v874_v49, %v872_v47 }
 0x48f   :  { %677 = vst [vmem:[#allocation10] sm:$0xff] %v676_v50 }
 0x490   :  { %966 = shalt.err (!%p963_p10)
}
 0x491   :  { %687 = dma.vmem_to_hbm [thread:$0]  %s685_s13, 128, %s1172_s9, [#allocation4]  }
 0x492   :  { %981 = dma.done.wait [#allocation4], 128  }
 0x493   :  { %982 = vsyncadd [#allocation4], 4294967168 }
 0x494   :  { %691 = vsyncpa [#allocation3], 1 }
 0x495   :  { %692 = vsyncpa [#allocation6], 1 }
 0x496   :  { %693 = vsyncpa [#allocation9], 1 }
 0x497   :  { %694 = vsyncpa [#allocation4], 1 }

</bundles_post_ra>
